<compile_context>
chip_gen: v5e
topology: v5e:2x2
jax: 0.10.0
libtpu: 0.0.40
codegen_flags: <defaults>
</compile_context>

<pallas_src>
import jax
import jax.numpy as jnp
from jax.experimental import pallas as pl
from jax.experimental.pallas import tpu as pltpu


def _simple_dot_kernel(user_ref, cand_ref, out_ref):
    # user_ref: (TB, D, 1)   cand_ref: (TB, D, N)   out_ref: (TB, 1, N)
    u = user_ref[...].astype(jnp.float32)          # (TB, D, 1)
    c = cand_ref[...].astype(jnp.float32)          # (TB, D, N)
    # VPU elementwise multiply (lane-broadcast of the 1-lane user tile) +
    # XLU cross-sublane reduce over D.  No MXU for this M=1 contraction.
    acc = jnp.sum(u * c, axis=1, keepdims=True)    # (TB, 1, N), f32
    out_ref[...] = acc.astype(out_ref.dtype)


def _round_up(x, m):
    return ((x + m - 1) // m) * m


def simple_dot(user_rep, candidate_reps, *, block_rows=None,
               vmem_tile_budget_bytes=24 * 1024 * 1024):
    """user_rep: (B, D); candidate_reps: (B, D, N) -> torch-style squeezed result."""
    B, D = user_rep.shape
    Bc, Dc, N = candidate_reps.shape
    assert B == Bc and D == Dc, "dim_user_rep must equal dim_cand_rep"

    out_dtype = jnp.result_type(user_rep.dtype, candidate_reps.dtype)

    # --- choose TB (rows per grid step) against a double-buffered VMEM budget,
    #     accounting for (sublane, lane) = (8, 128) padding of each block's tile.
    cand_row = _round_up(D, 8) * _round_up(N, 128) * candidate_reps.dtype.itemsize
    user_row = _round_up(D, 8) * 128 * user_rep.dtype.itemsize          # (TB, D, 1)
    out_row = 8 * _round_up(N, 128) * jnp.dtype(out_dtype).itemsize     # (TB, 1, N)
    per_row = 2 * (cand_row + user_row + out_row)   # x2: double-buffered pipeline
    tb_cap = max(1, vmem_tile_budget_bytes // per_row)

    if block_rows is not None:
        tb = max(1, min(block_rows, B))
    elif B <= tb_cap:
        tb = B                                      # single full block
    else:
        tb = (tb_cap // 8) * 8 if tb_cap >= 8 else tb_cap
    grid_b = pl.cdiv(B, tb)

    user3 = user_rep[:, :, None]                    # (B, D, 1) — free XLA reshape

    out = pl.pallas_call(
        _simple_dot_kernel,
        out_shape=jax.ShapeDtypeStruct((B, 1, N), out_dtype),
        grid_spec=pltpu.PrefetchScalarGridSpec(
            num_scalar_prefetch=0,
            grid=(grid_b,),
            in_specs=[
                pl.BlockSpec((tb, D, 1), lambda b: (b, 0, 0)),
                pl.BlockSpec((tb, D, N), lambda b: (b, 0, 0)),
            ],
            out_specs=pl.BlockSpec((tb, 1, N), lambda b: (b, 0, 0)),
        ),
        compiler_params=pltpu.CompilerParams(
            dimension_semantics=("parallel",),      # v7x: shard batch over 2 TCs
            vmem_limit_bytes=48 * 1024 * 1024,      # raise v5e/v6e scoped default
        ),
    )(user3, candidate_reps)

    # torch .squeeze() removes *all* size-1 dims (the bmm "1", plus B==1/N==1).
    return jnp.squeeze(out)


if __name__ == "__main__":
    key = jax.random.PRNGKey(0)
    k1, k2, k3, k4 = jax.random.split(key, 4)

    # Small shapes implied by the module: batch=2, rep dim=32, candidates=8.
    B, D, N = 2, 32, 8
    user_rep = jax.random.normal(k1, (B, D), dtype=jnp.float32)
    candidate_reps = jax.random.normal(k2, (B, D, N), dtype=jnp.float32)

    out = jax.block_until_ready(simple_dot(user_rep, candidate_reps))
    ref = jnp.squeeze(jnp.einsum("bd,bdn->bn", user_rep, candidate_reps))
    assert out.shape == ref.shape, (out.shape, ref.shape)
    assert jnp.allclose(out, ref, atol=1e-5, rtol=1e-5)

    # Exercise the row-batched multi-step grid path too.
    B2 = 32
    user2 = jax.random.normal(k3, (B2, D), dtype=jnp.float32)
    cand2 = jax.random.normal(k4, (B2, D, N), dtype=jnp.float32)
    out2 = jax.block_until_ready(simple_dot(user2, cand2, block_rows=8))
    ref2 = jnp.squeeze(jnp.einsum("bd,bdn->bn", user2, cand2))
    assert out2.shape == ref2.shape, (out2.shape, ref2.shape)
    assert jnp.allclose(out2, ref2, atol=1e-4, rtol=1e-4)

    print("KERNEL_OK")
</pallas_src>

<mosaic_0001>
module attributes {stable_mosaic.version = 11 : i64} {
  func.func @_simple_dot_kernel(%arg0: i32, %arg1: memref<2x32x1xf32, #tpu.memory_space<vmem>>, %arg2: memref<2x32x8xf32, #tpu.memory_space<vmem>>, %arg3: memref<2x1x8xf32, #tpu.memory_space<vmem>>) attributes {dimension_semantics = [#tpu.dimension_semantics<parallel>], iteration_bounds = array<i64: 1>, scalar_prefetch = 0 : i64, scratch_operands = 0 : i64, tpu.core_type = #tpu.core_type<tc>, window_params = [{transform_indices = @transform_0, window_bounds = array<i64: 2, 32, 1>}, {transform_indices = @transform_1, window_bounds = array<i64: 2, 32, 8>}, {transform_indices = @transform_2, window_bounds = array<i64: 2, 1, 8>}]} {
    %c0 = arith.constant 0 : index
    %c0_0 = arith.constant 0 : index
    %c0_1 = arith.constant 0 : index
    %0 = vector.load %arg1[%c0, %c0_0, %c0_1] : memref<2x32x1xf32, #tpu.memory_space<vmem>>, vector<2x32x1xf32>
    %c0_2 = arith.constant 0 : index
    %c0_3 = arith.constant 0 : index
    %c0_4 = arith.constant 0 : index
    %1 = vector.load %arg2[%c0_2, %c0_3, %c0_4] : memref<2x32x8xf32, #tpu.memory_space<vmem>>, vector<2x32x8xf32>
    %2 = vector.broadcast %0 : vector<2x32x1xf32> to vector<2x32x8xf32>
    %3 = arith.mulf %2, %1 : vector<2x32x8xf32>
    %cst = arith.constant dense<0.000000e+00> : vector<2x8xf32>
    %4 = vector.multi_reduction <add>, %3, %cst [1] : vector<2x32x8xf32> to vector<2x8xf32>
    %5 = vector.shape_cast %4 : vector<2x8xf32> to vector<2x1x8xf32>
    %c0_5 = arith.constant 0 : index
    %c0_6 = arith.constant 0 : index
    %c0_7 = arith.constant 0 : index
    %6 = vector.load %arg3[%c0_5, %c0_6, %c0_7] : memref<2x1x8xf32, #tpu.memory_space<vmem>>, vector<2x1x8xf32>
    tpu.vector_store %arg3[%c0_5, %c0_6, %c0_7], %5 {strides = array<i32>} : memref<2x1x8xf32, #tpu.memory_space<vmem>>, vector<2x1x8xf32>,
    return
  }
  func.func @transform_0(%arg0: i32) -> (i32, i32, i32) {
    %c0_i32 = arith.constant 0 : i32
    %c0_i32_0 = arith.constant 0 : i32
    %c0_i32_1 = arith.constant 0 : i32
    return %arg0, %c0_i32, %c0_i32_0 : i32, i32, i32
  }
  func.func @transform_1(%arg0: i32) -> (i32, i32, i32) {
    %c0_i32 = arith.constant 0 : i32
    %c0_i32_0 = arith.constant 0 : i32
    %c0_i32_1 = arith.constant 0 : i32
    return %arg0, %c0_i32, %c0_i32_0 : i32, i32, i32
  }
  func.func @transform_2(%arg0: i32) -> (i32, i32, i32) {
    %c0_i32 = arith.constant 0 : i32
    %c0_i32_0 = arith.constant 0 : i32
    %c0_i32_1 = arith.constant 0 : i32
    return %arg0, %c0_i32, %c0_i32_0 : i32, i32, i32
  }
}

</mosaic_0001>

<bundles_post_ra>
// kernel: tpu_custom_call.1
= control target key start
LH: loop header
LB: loop body
LE: loop exit
PB: predicated region body
PF: predicated region fallthrough
CT: control target
= control target key end

     0   :  { %v157_v2 = vmov 0   ;;  %s235_s0 = inlined_call_operand.vmem [shape: f32[2,32,1], index: 0, kind: input, shape index: {}]   ;;  %s236_s1 = inlined_call_operand.vmem [shape: f32[2,32,8], index: 1, kind: input, shape index: {}]   ;;  %s237_s2 = inlined_call_operand.hbm [shape: f32[2,1,8], index: 2, kind: output, shape index: {}]  }
   0x1   :  { %v16_v0 = vld [vmem:[%s235_s0 + $0x20] sm:$0xff]  ;;  %129 = vset.pattern.permute.xlu1 %v157_v2  ;;  %128 = vset.pattern.permute.xlu0 %v157_v2  ;;  %v14_v3 = vld [vmem:[%s235_s0 + $0x10] sm:$0xff] }
   0x2   :  { %v12_v1 = vld [vmem:[%s235_s0] sm:$0xff]  ;;  %50 = vperm.xlu1 %129, %v16_v0   ;;  %130 = vset.pattern.permute.xlu2 %v157_v2 }
   0x3   :  { %30 = vperm.xlu0 %128, %v12_v1  }
   0x4   :  { %7 = vsyncpa [#allocation3], 0  ;;  %40 = vperm.xlu2 %130, %v14_v3   ;;  %v17_v4 = vld [vmem:[%s235_s0 + $0x28] sm:$0xff]  ;;  %v18_v6 = vld [vmem:[%s235_s0 + $0x30] sm:$0xff]  ;;  %vm76_vm0 = vcmask 64512   ;;  %s112_s15 = sshll.u32 %s237_s2, 4  ;;  %s113_s15 = int_to_ptr.hbm [resolvable:$true] %s112_s15 }
   0x5   :  { %v13_v5 = vld [vmem:[%s235_s0 + $0x8] sm:$0xff]  ;;  %v19_v7 = vld [vmem:[%s235_s0 + $0x38] sm:$0xff]  ;;  %v24_v12 = vld [vmem:[%s236_s1 + $0x20] sm:$0xff]  ;;  %vm103_vm1 = vcmask 57344   ;;  %s159_s16 = smov 16   ;;  %s160_s17 = smov 1  }
   0x6   :  { %v15_v8 = vld [vmem:[%s235_s0 + $0x18] sm:$0xff]  ;;  %v20_v13 = vld [vmem:[%s236_s1] sm:$0xff]  ;;  %v25_v14 = vld [vmem:[%s236_s1 + $0x28] sm:$0xff] }
   0x7   :  { %v21_v15 = vld [vmem:[%s236_s1 + $0x8] sm:$0xff]  ;;  %v22_v22 = vld [vmem:[%s236_s1 + $0x10] sm:$0xff]  ;;  %v27_v33 = vld [vmem:[%s236_s1 + $0x38] sm:$0xff] }
   0x8   :  { %v26_v23 = vld [vmem:[%s236_s1 + $0x30] sm:$0xff]  ;;  %v23_v34 = vld [vmem:[%s236_s1 + $0x18] sm:$0xff]  ;;  %s158_s1 = smov [#allocation2]  }
   0x9   :  { %s110_s12 = sshll.u32 %s158_s1, 4  ;;  %s111_s12 = int_to_ptr.vmem [resolvable:$true] %s110_s12 }
   0xa   :  { %55 = vperm.xlu1 %129, %v17_v4  }
   0xb   :  { %35 = vperm.xlu0 %128, %v13_v5  }
   0xc   :  { %60 = vperm.xlu2 %130, %v18_v6  }
  0x12   :  { %65 = vperm.xlu1 %129, %v19_v7  }
  0x13   :  { %45 = vperm.xlu0 %128, %v15_v8  }
  0x5e   :  { %v41_v9 = vpop.permute.xlu2 %40 }
  0x5f   :  { %v70_v27 = vmul.f32 %v41_v9, %v22_v22 }
  0x61   :  { %v80_v37 = vsel %vm76_vm0, %v70_v27, 0.0 }
  0x66   :  { %v61_v24 = vpop.permute.xlu2 %60 }
  0x67   :  { %v74_v30 = vmul.f32 %v61_v24, %v26_v23 }
  0x69   :  { %v93_v38 = vsel %vm76_vm0, %v74_v30, 0.0 }
  0x74   :  { %v51_v10 = vpop.permute.xlu1 %50 }
  0x75   :  { %v31_v11 = vpop.permute.xlu0 %30  ;;  %v72_v18 = vmul.f32 %v51_v10, %v24_v12 }
  0x76   :  { %v68_v19 = vmul.f32 %v31_v11, %v20_v13 }
  0x77   :  { %v90_v28 = vsel %vm76_vm0, %v72_v18, 0.0 }
  0x78   :  { %v77_v29 = vsel %vm76_vm0, %v68_v19, 0.0 }
  0x7c   :  { %v56_v16 = vpop.permute.xlu1 %55 }
  0x7d   :  { %v36_v17 = vpop.permute.xlu0 %35  ;;  %v73_v20 = vmul.f32 %v56_v16, %v25_v14 }
  0x7e   :  { %v69_v21 = vmul.f32 %v36_v17, %v21_v15 }
  0x7f   :  { %v91_v25 = vsel %vm76_vm0, %v73_v20, 0.0 }
  0x80   :  { %v78_v26 = vsel %vm76_vm0, %v69_v21, 0.0  ;;  %v92_v31 = vadd.f32 %v91_v25, %v90_v28 }
  0x81   :  { %v79_v32 = vadd.f32 %v78_v26, %v77_v29 }
  0x82   :  { %v94_v41 = vadd.f32 %v93_v38, %v92_v31 }
  0x83   :  { %v81_v42 = vadd.f32 %v80_v37, %v79_v32 }
  0x84   :  { %v66_v35 = vpop.permute.xlu1 %65 }
  0x85   :  { %v46_v36 = vpop.permute.xlu0 %45  ;;  %v75_v39 = vmul.f32 %v66_v35, %v27_v33 }
  0x86   :  { %v71_v40 = vmul.f32 %v46_v36, %v23_v34 }
  0x87   :  { %v95_v43 = vsel %vm76_vm0, %v75_v39, 0.0 }
  0x88   :  { %v82_v44 = vsel %vm76_vm0, %v71_v40, 0.0  ;;  %v96_v45 = vadd.f32 %v95_v43, %v94_v41 }
  0x89   :  { %v83_v46 = vadd.f32 %v82_v44, %v81_v42 }
  0x8a   :  { %v97_v47 = vrot.slane %v96_v45, 4 }
  0x8b   :  { %v84_v48 = vrot.slane %v83_v46, 4 }
  0x8c   :  { %v98_v49 = vadd.f32 %v97_v47, %v96_v45 }
  0x8d   :  { %v85_v50 = vadd.f32 %v84_v48, %v83_v46 }
  0x8e   :  { %v99_v51 = vrot.slane %v98_v49, 2 }
  0x8f   :  { %v86_v52 = vrot.slane %v85_v50, 2 }
  0x90   :  { %v100_v53 = vadd.f32 %v99_v51, %v98_v49 }
  0x91   :  { %v87_v54 = vadd.f32 %v86_v52, %v85_v50 }
  0x92   :  { %v101_v55 = vrot.slane %v100_v53, 1 }
  0x93   :  { %v88_v56 = vrot.slane %v87_v54, 1 }
  0x94   :  { %v102_v57 = vadd.f32 %v101_v55, %v100_v53 }
  0x95   :  { %v89_v58 = vadd.f32 %v88_v56, %v87_v54 }
  0x96   :  { %105 = vst.msk [vmem:[#allocation2 + $0x1] sm:$0x1] %vm103_vm1, %v102_v57 }
  0x97   :  { %104 = vst.msk [vmem:[#allocation2] sm:$0x1] %vm103_vm1, %v89_v58 }
  0x98   :  { %118 = dma.vmem_to_hbm [thread:$0]  %s111_s12, 32, %s113_s15, [#allocation3], %s159_s16, %s159_s16, %s160_s17  }
  0x99   :  { %155 = dma.done.wait [#allocation3], 32  }
  0x9a   :  { %156 = vsyncadd [#allocation3], 4294967264 }
  0x9b   :  { %123 = vsyncpa [#allocation3], 1 }

</bundles_post_ra>
